<compile_context>
chip_gen: v7x
topology: tpu7x:2x2x1
jax: 0.10.0
libtpu: 0.0.40
codegen_flags: <defaults>
</compile_context>

<pallas_src>
import functools

import jax
import jax.numpy as jnp
from jax.experimental import pallas as pl
from jax.experimental.pallas import tpu as pltpu

INPUT_SIZE = 10
HIDDEN_SIZE = 32
MID_SIZE = 16
NUM_CLASSES = 3
BN_EPS = 1e-5

MIN_TB = 128           # lane granularity
MAX_TB = 32768         # max batch-tile (lane) width; ~13 MB VMEM footprint
VMEM_LIMIT_BYTES = 32 * 1024 * 1024  # explicit (v5e scoped default is only 16 MiB)


def _round_up(n, m):
    return ((n + m - 1) // m) * m


def _cdiv(a, b):
    return -(-a // b)


def _pick_tiling(batch):
    """Choose (#tiles, tile width) for the batch/lane axis.

    Pads only to a multiple of 128 and splits into equal 128-aligned tiles,
    so padding waste is < 128 columns per tile.  Large single-tile batches are
    split in two so both v7x TensorCores are fed.
    """
    b128 = _round_up(max(batch, 1), MIN_TB)
    n = _cdiv(b128, MAX_TB)
    if n == 1 and b128 >= 4096:
        n = 2  # megacore: give each TensorCore a tile on v7x
    tb = _round_up(_cdiv(b128, n), MIN_TB)
    return n, tb


def _mlp_kernel_t(xt_ref, w1t_ref, b1_ref, w2t_ref, b2_ref, w3t_ref, b3_ref,
                  o_ref):
    """Feature-major MLP: all operands are (features, batch_tile)."""
    xt = xt_ref[...].astype(jnp.float32)                               # (10, TB)

    # Linear(10 -> 32) + ReLU
    h = jnp.dot(w1t_ref[...], xt, preferred_element_type=jnp.float32)  # (32, TB)
    h = jnp.maximum(h + b1_ref[...], 0.0)

    # BatchNorm1d(32) eval: folded into W2/b2 in prepare_params.
    # Dropout(p=0.2): identity in eval mode.

    # Linear(32 -> 16) (BN-folded) + ReLU
    h = jnp.dot(w2t_ref[...], h, preferred_element_type=jnp.float32)   # (16, TB)
    h = jnp.maximum(h + b2_ref[...], 0.0)

    # Dropout(p=0.2): identity in eval mode.

    # Linear(16 -> 3)
    o = jnp.dot(w3t_ref[...], h, preferred_element_type=jnp.float32)   # (3, TB)
    o_ref[...] = o + b3_ref[...]


def prepare_params(params):
    """One-time: fold eval BatchNorm into Linear2 and re-layout feature-major.

    relu(x@W1+b1) -> *scale + shift -> @W2 + b2
      ==  relu(x@W1+b1) @ (scale[:,None]*W2) + (shift@W2 + b2)
    """
    (w1, b1, bn_gamma, bn_beta, bn_mean, bn_var, w2, b2, w3, b3) = params
    inv_std = 1.0 / jnp.sqrt(bn_var + BN_EPS)
    bn_scale = bn_gamma * inv_std                      # (32,)
    bn_shift = bn_beta - bn_mean * bn_scale            # (32,)
    w2f = bn_scale[:, None] * w2                       # (32, 16)
    b2f = b2 + bn_shift @ w2                           # (16,)

    w1t = jnp.asarray(w1.T, jnp.float32)               # (32, 10)
    w2t = jnp.asarray(w2f.T, jnp.float32)              # (16, 32)
    w3t = jnp.asarray(w3.T, jnp.float32)               # (3, 16)
    b1c = jnp.asarray(b1, jnp.float32).reshape(HIDDEN_SIZE, 1)
    b2c = jnp.asarray(b2f, jnp.float32).reshape(MID_SIZE, 1)
    b3c = jnp.asarray(b3, jnp.float32).reshape(NUM_CLASSES, 1)
    return (w1t, b1c, w2t, b2c, w3t, b3c)


def _mlp_pallas(xt_padded, kparams, n_tiles, tb):
    """xt_padded: (INPUT_SIZE, n_tiles * tb) -> (NUM_CLASSES, n_tiles * tb)."""
    w1t, b1c, w2t, b2c, w3t, b3c = kparams
    b_pad = n_tiles * tb

    flops = 2 * b_pad * (INPUT_SIZE * HIDDEN_SIZE
                         + HIDDEN_SIZE * MID_SIZE
                         + MID_SIZE * NUM_CLASSES)
    param_bytes = 4 * (INPUT_SIZE * HIDDEN_SIZE + HIDDEN_SIZE
                       + HIDDEN_SIZE * MID_SIZE + MID_SIZE
                       + MID_SIZE * NUM_CLASSES + NUM_CLASSES)
    bytes_accessed = (xt_padded.dtype.itemsize * b_pad * INPUT_SIZE
                      + 4 * b_pad * NUM_CLASSES + param_bytes)

    return pl.pallas_call(
        _mlp_kernel_t,
        out_shape=jax.ShapeDtypeStruct((NUM_CLASSES, b_pad), jnp.float32),
        grid=(n_tiles,),
        in_specs=[
            pl.BlockSpec((INPUT_SIZE, tb), lambda i: (0, i)),            # xT tile
            pl.BlockSpec((HIDDEN_SIZE, INPUT_SIZE), lambda i: (0, 0)),   # W1^T
            pl.BlockSpec((HIDDEN_SIZE, 1), lambda i: (0, 0)),            # b1
            pl.BlockSpec((MID_SIZE, HIDDEN_SIZE), lambda i: (0, 0)),     # W2f^T
            pl.BlockSpec((MID_SIZE, 1), lambda i: (0, 0)),               # b2f
            pl.BlockSpec((NUM_CLASSES, MID_SIZE), lambda i: (0, 0)),     # W3^T
            pl.BlockSpec((NUM_CLASSES, 1), lambda i: (0, 0)),            # b3
        ],
        out_specs=pl.BlockSpec((NUM_CLASSES, tb), lambda i: (0, i)),
        compiler_params=pltpu.CompilerParams(
            dimension_semantics=("parallel",),
            vmem_limit_bytes=VMEM_LIMIT_BYTES),
        cost_estimate=pl.CostEstimate(
            flops=int(flops),
            transcendentals=0,
            bytes_accessed=int(bytes_accessed)),
    )(xt_padded, w1t, b1c, w2t, b2c, w3t, b3c)


@jax.jit
def technical_indicator_forward(x, kparams):
    """Batch-major contract: x (B, INPUT_SIZE) -> (B, NUM_CLASSES), f32 out.

    x may be float32 or bfloat16 (bf16 halves the dominant input HBM stream;
    the kernel upcasts and accumulates in f32).
    """
    batch = x.shape[0]
    n_tiles, tb = _pick_tiling(batch)
    b_pad = n_tiles * tb
    xt = jnp.pad(x.T, ((0, 0), (0, b_pad - batch)))
    out_t = _mlp_pallas(xt, kparams, n_tiles, tb)
    return out_t[:, :batch].T


@jax.jit
def technical_indicator_forward_fm(xt, kparams):
    """Feature-major contract (preferred, no transposes):
    xt (INPUT_SIZE, B) -> (NUM_CLASSES, B), f32 out."""
    batch = xt.shape[1]
    n_tiles, tb = _pick_tiling(batch)
    b_pad = n_tiles * tb
    xt_p = jnp.pad(xt, ((0, 0), (0, b_pad - batch)))
    return _mlp_pallas(xt_p, kparams, n_tiles, tb)[:, :batch]


def init_params(key):
    """Deterministic synthetic parameters matching the PyTorch module shapes."""
    ks = jax.random.split(key, 6)

    def linear_init(kw, kb, fan_in, fan_out):
        # Mimic PyTorch default: U(-1/sqrt(fan_in), 1/sqrt(fan_in))
        bound = 1.0 / jnp.sqrt(jnp.float32(fan_in))
        w = jax.random.uniform(kw, (fan_in, fan_out), jnp.float32, -bound, bound)
        b = jax.random.uniform(kb, (fan_out,), jnp.float32, -bound, bound)
        return w, b

    w1, b1 = linear_init(ks[0], ks[1], INPUT_SIZE, HIDDEN_SIZE)
    w2, b2 = linear_init(ks[2], ks[3], HIDDEN_SIZE, MID_SIZE)
    w3, b3 = linear_init(ks[4], ks[5], MID_SIZE, NUM_CLASSES)

    # BatchNorm1d affine + running stats (non-trivial so the fold is exercised).
    bn_gamma = jnp.ones((HIDDEN_SIZE,), jnp.float32) * 1.1
    bn_beta = jnp.full((HIDDEN_SIZE,), 0.05, jnp.float32)
    bn_mean = jnp.full((HIDDEN_SIZE,), 0.1, jnp.float32)
    bn_var = jnp.full((HIDDEN_SIZE,), 0.9, jnp.float32)

    return (w1, b1, bn_gamma, bn_beta, bn_mean, bn_var, w2, b2, w3, b3)


def reference_forward(x, params):
    """Pure-JAX reference (eval-mode semantics)."""
    (w1, b1, bn_gamma, bn_beta, bn_mean, bn_var, w2, b2, w3, b3) = params
    h = jnp.maximum(x @ w1 + b1, 0.0)
    h = (h - bn_mean) / jnp.sqrt(bn_var + BN_EPS) * bn_gamma + bn_beta
    h = jnp.maximum(h @ w2 + b2, 0.0)
    return h @ w3 + b3


if __name__ == "__main__":
    key = jax.random.PRNGKey(0)
    k_x, k_x2, k_x3, k_p = jax.random.split(key, 4)
    params = init_params(k_p)
    kparams = prepare_params(params)  # hoisted, one-time BN fold + relayout

    # 1) Small primary check (module's expected small-batch use).
    batch = 8
    x = jax.random.normal(k_x, (batch, INPUT_SIZE), jnp.float32)
    out = jax.block_until_ready(technical_indicator_forward(x, kparams))
    ref = reference_forward(x, params)
    assert out.shape == (batch, NUM_CLASSES)
    assert jnp.allclose(out, ref, atol=1e-5, rtol=1e-5)

    # 2) Batch not a multiple of the lane tile (pad/slice path) + feature-major API.
    batch2 = 200
    x2 = jax.random.normal(k_x2, (batch2, INPUT_SIZE), jnp.float32)
    out2 = jax.block_until_ready(technical_indicator_forward(x2, kparams))
    ref2 = reference_forward(x2, params)
    assert out2.shape == (batch2, NUM_CLASSES)
    assert jnp.allclose(out2, ref2, atol=1e-5, rtol=1e-5)

    out2_fm = jax.block_until_ready(technical_indicator_forward_fm(x2.T, kparams))
    assert out2_fm.shape == (NUM_CLASSES, batch2)
    assert jnp.allclose(out2_fm.T, ref2, atol=1e-5, rtol=1e-5)

    # 3) Multi-tile path (batch split across >=2 grid steps / TensorCores).
    batch3 = 4500
    x3 = jax.random.normal(k_x3, (batch3, INPUT_SIZE), jnp.float32)
    out3 = jax.block_until_ready(technical_indicator_forward(x3, kparams))
    ref3 = reference_forward(x3, params)
    assert out3.shape == (batch3, NUM_CLASSES)
    assert jnp.allclose(out3, ref3, atol=1e-5, rtol=1e-5)

    # 4) bfloat16 input stream (halves the dominant DMA); looser tolerance.
    out2_bf16 = jax.block_until_ready(
        technical_indicator_forward(x2.astype(jnp.bfloat16), kparams))
    assert out2_bf16.shape == (batch2, NUM_CLASSES)
    assert jnp.allclose(out2_bf16, ref2, atol=3e-2, rtol=3e-2)

    print("KERNEL_OK")
</pallas_src>

<mosaic_0001>
module attributes {stable_mosaic.version = 11 : i64} {
  func.func @_mlp_kernel_t(%arg0: i32, %arg1: memref<10x128xf32, #tpu.memory_space<vmem>>, %arg2: memref<32x10xf32, #tpu.memory_space<vmem>>, %arg3: memref<32x1xf32, #tpu.memory_space<vmem>>, %arg4: memref<16x32xf32, #tpu.memory_space<vmem>>, %arg5: memref<16x1xf32, #tpu.memory_space<vmem>>, %arg6: memref<3x16xf32, #tpu.memory_space<vmem>>, %arg7: memref<3x1xf32, #tpu.memory_space<vmem>>, %arg8: memref<3x128xf32, #tpu.memory_space<vmem>>) attributes {dimension_semantics = [#tpu.dimension_semantics<parallel>], iteration_bounds = array<i64: 1>, scalar_prefetch = 0 : i64, scratch_operands = 0 : i64, tpu.core_type = #tpu.core_type<tc>, window_params = [{transform_indices = @transform_0, window_bounds = array<i64: 10, 128>}, {pipeline_mode = #tpu.pipeline_mode<synchronous>, transform_indices = @transform_1, window_bounds = array<i64: 32, 10>}, {pipeline_mode = #tpu.pipeline_mode<synchronous>, transform_indices = @transform_2, window_bounds = array<i64: 32, 1>}, {pipeline_mode = #tpu.pipeline_mode<synchronous>, transform_indices = @transform_3, window_bounds = array<i64: 16, 32>}, {pipeline_mode = #tpu.pipeline_mode<synchronous>, transform_indices = @transform_4, window_bounds = array<i64: 16, 1>}, {pipeline_mode = #tpu.pipeline_mode<synchronous>, transform_indices = @transform_5, window_bounds = array<i64: 3, 16>}, {pipeline_mode = #tpu.pipeline_mode<synchronous>, transform_indices = @transform_6, window_bounds = array<i64: 3, 1>}, {transform_indices = @transform_7, window_bounds = array<i64: 3, 128>}]} {
    %c0 = arith.constant 0 : index
    %c0_0 = arith.constant 0 : index
    %0 = vector.load %arg1[%c0, %c0_0] : memref<10x128xf32, #tpu.memory_space<vmem>>, vector<10x128xf32>
    %c0_1 = arith.constant 0 : index
    %c0_2 = arith.constant 0 : index
    %1 = vector.load %arg2[%c0_1, %c0_2] : memref<32x10xf32, #tpu.memory_space<vmem>>, vector<32x10xf32>
    %cst = arith.constant dense<0.000000e+00> : vector<32x128xf32>
    %2 = tpu.matmul %1, %0, %cst {dimension_numbers = #tpu.dot_dimension_numbers<[1], [0], [0], [1], [0, 0, 1, 1], [], []>} : vector<32x10xf32>, vector<10x128xf32>, vector<32x128xf32> -> vector<32x128xf32>
    %c0_3 = arith.constant 0 : index
    %c0_4 = arith.constant 0 : index
    %3 = vector.load %arg3[%c0_3, %c0_4] : memref<32x1xf32, #tpu.memory_space<vmem>>, vector<32x1xf32>
    %4 = vector.broadcast %3 : vector<32x1xf32> to vector<32x128xf32>
    %5 = arith.addf %2, %4 : vector<32x128xf32>
    %cst_5 = arith.constant 0.000000e+00 : f32
    %6 = vector.broadcast %cst_5 : f32 to vector<32x128xf32>
    %7 = arith.maximumf %5, %6 : vector<32x128xf32>
    %c0_6 = arith.constant 0 : index
    %c0_7 = arith.constant 0 : index
    %8 = vector.load %arg4[%c0_6, %c0_7] : memref<16x32xf32, #tpu.memory_space<vmem>>, vector<16x32xf32>
    %cst_8 = arith.constant dense<0.000000e+00> : vector<16x128xf32>
    %9 = tpu.matmul %8, %7, %cst_8 {dimension_numbers = #tpu.dot_dimension_numbers<[1], [0], [0], [1], [0, 0, 1, 1], [], []>} : vector<16x32xf32>, vector<32x128xf32>, vector<16x128xf32> -> vector<16x128xf32>
    %c0_9 = arith.constant 0 : index
    %c0_10 = arith.constant 0 : index
    %10 = vector.load %arg5[%c0_9, %c0_10] : memref<16x1xf32, #tpu.memory_space<vmem>>, vector<16x1xf32>
    %11 = vector.broadcast %10 : vector<16x1xf32> to vector<16x128xf32>
    %12 = arith.addf %9, %11 : vector<16x128xf32>
    %cst_11 = arith.constant 0.000000e+00 : f32
    %13 = vector.broadcast %cst_11 : f32 to vector<16x128xf32>
    %14 = arith.maximumf %12, %13 : vector<16x128xf32>
    %c0_12 = arith.constant 0 : index
    %c0_13 = arith.constant 0 : index
    %15 = vector.load %arg6[%c0_12, %c0_13] : memref<3x16xf32, #tpu.memory_space<vmem>>, vector<3x16xf32>
    %cst_14 = arith.constant dense<0.000000e+00> : vector<3x128xf32>
    %16 = tpu.matmul %15, %14, %cst_14 {dimension_numbers = #tpu.dot_dimension_numbers<[1], [0], [0], [1], [0, 0, 1, 1], [], []>} : vector<3x16xf32>, vector<16x128xf32>, vector<3x128xf32> -> vector<3x128xf32>
    %c0_15 = arith.constant 0 : index
    %c0_16 = arith.constant 0 : index
    %17 = vector.load %arg7[%c0_15, %c0_16] : memref<3x1xf32, #tpu.memory_space<vmem>>, vector<3x1xf32>
    %18 = vector.broadcast %17 : vector<3x1xf32> to vector<3x128xf32>
    %19 = arith.addf %16, %18 : vector<3x128xf32>
    %c0_17 = arith.constant 0 : index
    %c0_18 = arith.constant 0 : index
    %20 = vector.load %arg8[%c0_17, %c0_18] : memref<3x128xf32, #tpu.memory_space<vmem>>, vector<3x128xf32>
    tpu.vector_store %arg8[%c0_17, %c0_18], %19 {strides = array<i32>} : memref<3x128xf32, #tpu.memory_space<vmem>>, vector<3x128xf32>,
    return
  }
  func.func @transform_0(%arg0: i32) -> (i32, i32) {
    %c0_i32 = arith.constant 0 : i32
    %c0_i32_0 = arith.constant 0 : i32
    return %c0_i32, %arg0 : i32, i32
  }
  func.func @transform_1(%arg0: i32) -> (i32, i32) {
    %c0_i32 = arith.constant 0 : i32
    %c0_i32_0 = arith.constant 0 : i32
    %c0_i32_1 = arith.constant 0 : i32
    return %c0_i32, %c0_i32_0 : i32, i32
  }
  func.func @transform_2(%arg0: i32) -> (i32, i32) {
    %c0_i32 = arith.constant 0 : i32
    %c0_i32_0 = arith.constant 0 : i32
    %c0_i32_1 = arith.constant 0 : i32
    return %c0_i32, %c0_i32_0 : i32, i32
  }
  func.func @transform_3(%arg0: i32) -> (i32, i32) {
    %c0_i32 = arith.constant 0 : i32
    %c0_i32_0 = arith.constant 0 : i32
    %c0_i32_1 = arith.constant 0 : i32
    return %c0_i32, %c0_i32_0 : i32, i32
  }
  func.func @transform_4(%arg0: i32) -> (i32, i32) {
    %c0_i32 = arith.constant 0 : i32
    %c0_i32_0 = arith.constant 0 : i32
    %c0_i32_1 = arith.constant 0 : i32
    return %c0_i32, %c0_i32_0 : i32, i32
  }
  func.func @transform_5(%arg0: i32) -> (i32, i32) {
    %c0_i32 = arith.constant 0 : i32
    %c0_i32_0 = arith.constant 0 : i32
    %c0_i32_1 = arith.constant 0 : i32
    return %c0_i32, %c0_i32_0 : i32, i32
  }
  func.func @transform_6(%arg0: i32) -> (i32, i32) {
    %c0_i32 = arith.constant 0 : i32
    %c0_i32_0 = arith.constant 0 : i32
    %c0_i32_1 = arith.constant 0 : i32
    return %c0_i32, %c0_i32_0 : i32, i32
  }
  func.func @transform_7(%arg0: i32) -> (i32, i32) {
    %c0_i32 = arith.constant 0 : i32
    %c0_i32_0 = arith.constant 0 : i32
    return %c0_i32, %arg0 : i32, i32
  }
}

</mosaic_0001>

<bundles_post_ra>
// kernel: technical_indicator_forward.1
= control target key start
LH: loop header
LB: loop body
LE: loop exit
PB: predicated region body
PF: predicated region fallthrough
CT: control target
= control target key end

     0   :  { %vm69_vm0 = vcmask 1041408   ;;  %vm56_vm1 = vcmask 80896   ;;  %vm421_vm2 = vmmov 1   ;;  %v422_v2 = vmov 0   ;;  %s523_s0 = inlined_call_operand.vmem [shape: f32[10,128], index: 0, kind: input, shape index: {}]   ;;  %s524_s1 = inlined_call_operand.vmem [shape: f32[32,10], index: 1, kind: input, shape index: {}]   ;;  %s525_s2 = inlined_call_operand.vmem [shape: f32[32,1], index: 2, kind: input, shape index: {}]   ;;  %s526_s4 = inlined_call_operand.vmem [shape: f32[16,1], index: 4, kind: input, shape index: {}]   ;;  %s527_s6 = inlined_call_operand.vmem [shape: f32[3,1], index: 6, kind: input, shape index: {}]   ;;  %s528_s3 = inlined_call_operand.vmem [shape: f32[16,32], index: 3, kind: input, shape index: {}]   ;;  %s529_s5 = inlined_call_operand.vmem [shape: f32[3,16], index: 5, kind: input, shape index: {}]   ;;  %s530_s7 = inlined_call_operand.vmem [shape: f32[3,128], index: 7, kind: output, shape index: {}]  }
   0x1   :  { %v26_v0 = vld [vmem:[%s523_s0] sm:$0xff]  ;;  %v27_v1 = vld [vmem:[%s523_s0 + $0x8] sm:$0x3]  ;;  %vm398_vm3 = vmpackc.low %vm69_vm0, %vm421_vm2  ;;  %419 = vset.pattern.permute.xlu0 %v422_v2  ;;  %420 = vset.pattern.permute.xlu1 %v422_v2  ;;  %vm176_vm4 = vcmask 261120   ;;  %v423_v35 = vmov 0.0|0.0   ;;  %vm424_vm5 = vmmov 0  }
   0x2   :  { %v397_v3 = vpack.c.bf16 %v27_v1, %v26_v0  ;;  %v28_v4 = vld [vmem:[%s524_s1] sm:$0xff]  ;;  %v34_v6 = vld [vmem:[%s525_s2 + $0x10] sm:$0xff]  ;;  %v29_v7 = vld [vmem:[%s524_s1 + $0x8] sm:$0xff]  ;;  %v425_v36 = vmov 0.0   ;;  %vm267_vm6 = vcmask 130048  }
   0x3   :  { %373 = vmatprep.mubr.msk.f32.mxu0 %vm56_vm1, %v28_v4  ;;  %v32_v5 = vld [vmem:[%s525_s2] sm:$0xff]  ;;  %v33_v8 = vld [vmem:[%s525_s2 + $0x8] sm:$0xff]  ;;  %48 = vperm.xlu1 %420, %v34_v6   ;;  %v30_v9 = vld [vmem:[%s524_s1 + $0x10] sm:$0xff] }
   0x4   :  { %399 = vmatprep.subr.msk.bf16.mxu0 %vm398_vm3, %v397_v3  ;;  %38 = vperm.xlu0 %419, %v32_v5   ;;  %v35_v10 = vld [vmem:[%s525_s2 + $0x18] sm:$0xff]  ;;  %v164_v12 = vld [vmem:[%s526_s4] sm:$0xff]  ;;  %v165_v13 = vld [vmem:[%s526_s4 + $0x8] sm:$0xff] }
   0x5   :  { %402 = vmatpush3.bf16.msk.msra.mxu0 %vm398_vm3, %v397_v3  ;;  %v31_v11 = vld [vmem:[%s524_s1 + $0x18] sm:$0xff]  ;;  %v261_v14 = vld [vmem:[%s527_s6] sm:$0x7]  ;;  %v163_v34 = vld [vmem:[%s528_s3 + $0x8] sm:$0xff] }
   0x6   :  { %v162_v15 = vld [vmem:[%s528_s3] sm:$0xff]  ;;  %411 = vmatprep.subr.bf16.mxu0 %v423_v35 }
   0x7   :  { %53 = vperm.xlu1 %420, %v35_v10   ;;  %387 = vmatprep.mubr.msk.f32.mxu1 %vm176_vm4, %v162_v15  ;;  %v260_v46 = vld [vmem:[%s529_s5] sm:$0x7] }
   0x8   :  { %374 = vmatmul.mubr.msk.f32.vlgmr.msra.gmra.mrb[0].mxu0 %vm56_vm1, %v29_v7  ;;  %43 = vperm.xlu0 %419, %v33_v8  }
   0x9   :  { %376 = vmatprep.mubr.msk.f32.mxu0 %vm56_vm1, %v30_v9 }
   0xb   :  { %173 = vperm.xlu1 %420, %v165_v13  }
   0xc   :  { %377 = vmatmul.mubr.msk.f32.gmra.mrb[2].mxu0 %vm56_vm1, %v31_v11  ;;  %168 = vperm.xlu0 %419, %v164_v12  }
   0xd   :  { %394 = vmatprep.mubr.msk.f32.mxu0 %vm424_vm5, %v425_v36 }
  0x10   :  { %264 = vperm.xlu0 %419, %v261_v14  }
  0x82   :  { %v49_v17 = vpop.permute.xlu1 %48 }
  0x83   :  { %v39_v16 = vpop.permute.xlu0 %38 }
  0x86   :  { %v54_v24 = vpop.permute.xlu1 %53 }
  0x87   :  { %v44_v18 = vpop.permute.xlu0 %43 }
  0x8a   :  { %v174_v37 = vpop.permute.xlu1 %173 }
  0x8b   :  { %v169_v39 = vpop.permute.xlu0 %168 }
  0x8f   :  { %v265_v47 = vpop.permute.xlu0 %264 }
  0xdb   :  { %v375_v19 = vpop.f32.mrb[0].mxu0 }
  0xdc   :  { %v145_v20 = vadd.f32 %v375_v19, %v44_v18  ;;  %v139_v21 = vpop.f32.mrb[1].mxu0 }
  0xdd   :  { %v140_v22 = vadd.f32 %v139_v21, %v39_v16 }
  0xde   :  { %v159_v23 = vmax.f32 %v145_v20, 0.0 }
  0xdf   :  { %v158_v25 = vmax.f32 %v140_v22, 0.0  ;;  %v378_v26 = vpop.f32.mrb[2].mxu0 }
  0xe0   :  { %v155_v27 = vadd.f32 %v378_v26, %v54_v24  ;;  %v149_v28 = vpop.f32.mrb[3].mxu0 }
  0xe1   :  { %v150_v29 = vadd.f32 %v149_v28, %v49_v17  ;;  %v403_v30 = vpack.c.bf16 %v159_v23, %v158_v25 }
  0xe2   :  { %v161_v31 = vmax.f32 %v155_v27, 0.0 }
  0xe3   :  { %v160_v32 = vmax.f32 %v150_v29, 0.0  ;;  %404 = vmatprep.subr.bf16.mxu1 %v403_v30 }
  0xe4   :  { %406 = vmatpush3.bf16.msra.mxu1 %v403_v30 }
  0xe5   :  { %v407_v33 = vpack.c.bf16 %v161_v31, %v160_v32 }
  0xe7   :  { %408 = vmatprep.subr.bf16.mxu1 %v407_v33 }
  0xe8   :  { %410 = vmatpush3.bf16.msra.mxu1 %v407_v33 }
  0xeb   :  { %388 = vmatmul.mubr.msk.f32.vlgmr.msra.gmra.mrb[0].mxu1 %vm176_vm4, %v163_v34 }
 0x1be   :  { %v389_v38 = vpop.f32.mrb[0].mxu1 }
 0x1bf   :  { %v255_v40 = vadd.f32 %v389_v38, %v174_v37  ;;  %v249_v41 = vpop.f32.mrb[1].mxu1 }
 0x1c0   :  { %v250_v42 = vadd.f32 %v249_v41, %v169_v39 }
 0x1c1   :  { %v259_v43 = vmax.f32 %v255_v40, 0.0 }
 0x1c2   :  { %v258_v44 = vmax.f32 %v250_v42, 0.0 }
 0x1c4   :  { %v412_v45 = vpack.c.bf16 %v259_v43, %v258_v44 }
 0x1c6   :  { %413 = vmatpush3.bf16.msra.mxu0 %v412_v45 }
 0x1c9   :  { %395 = vmatmul.mubr.msk.f32.vlgmr.msra.gmra.mrb[4].mxu0 %vm267_vm6, %v260_v46 }
 0x29c   :  { %v337_v48 = vpop.f32.mrb[4].mxu0 }
 0x29d   :  { %v338_v49 = vadd.f32 %v337_v48, %v265_v47  ;;  %v396_v50 = vpop.f32.mrb[5].mxu0 }
 0x29f   :  { %341 = vst [vmem:[%s530_s7] sm:$0x7] %v338_v49 }

</bundles_post_ra>
